<compile_context>
chip_gen: v6e
topology: v6e:2x2x1
jax: 0.10.0
libtpu: 0.0.40
codegen_flags: <defaults>
</compile_context>

<pallas_src>
import math
import jax
import jax.numpy as jnp
from jax.experimental import pallas as pl
from jax.experimental.pallas import tpu as pltpu

# ---- shapes consistent with the module's usage (FeedForward: dim=32, mult=4) ----
DIM_IN    = 32            # dim_in  (query_dim)
DIM_OUT   = 128           # dim_out (dim_in * mult)  -> lane-dense (multiple of 128)
B         = 2             # grids in the batch
N_PTS     = 128           # points per grid (dense analogue of the jagged jdata)
TILE_ROWS = 128           # rows per grid step


def _erf(z):
    # Abramowitz & Stegun 7.1.26 rational approximation (abs err ~1.5e-7), built from
    # exp / mul / select so it always lowers on Mosaic.  Divide is EUP-offloaded.
    a1, a2, a3, a4, a5 = 0.254829592, -0.284496736, 1.421413741, -1.453152027, 1.061405429
    p = 0.3275911
    sgn = jnp.where(z >= 0.0, 1.0, -1.0)
    az = jnp.abs(z)
    d = 1.0 + p * az
    t = pl.reciprocal(d, approx=True)     # EUP vrcp
    t = t * (2.0 - d * t)                 # one Newton step for accuracy
    poly = ((((a5 * t + a4) * t + a3) * t + a2) * t + a1) * t
    return sgn * (1.0 - poly * jnp.exp(-az * az))


def _gelu_exact(x):
    # matches torch.nn.functional.gelu (erf-based, default) to f32 tolerances
    return 0.5 * x * (1.0 + _erf(x * (1.0 / math.sqrt(2.0))))


def _geglu_kernel(x_ref, w_ref, b_ref, o_ref):
    dim_out = w_ref.shape[1] // 2

    x = x_ref[...].astype(jnp.bfloat16)          # (TILE_ROWS, dim_in)  bf16 MXU inputs
    w = w_ref[...]                               # (dim_in, 2*dim_out)  f32 load, sliced below

    # gate half first -> gelu temporaries die before the "x" half becomes live
    wg = w[:, dim_out:].astype(jnp.bfloat16)     # lane-aligned (128-boundary) slice
    gate = jnp.dot(x, wg, preferred_element_type=jnp.float32) + b_ref[1:2, :]
    g = _gelu_exact(gate)

    wa = w[:, :dim_out].astype(jnp.bfloat16)
    a = jnp.dot(x, wa, preferred_element_type=jnp.float32) + b_ref[0:1, :]

    o_ref[...] = a * g                           # lane-dense (TILE_ROWS, 128) store


def geglu(x2d, w, b, *, tile_rows=TILE_ROWS):
    """x2d: (rows, dim_in) f32, w: (dim_in, 2*dim_out) f32, b: (2*dim_out,) f32."""
    rows, dim_in = x2d.shape
    two_dout = w.shape[1]
    dim_out = two_dout // 2
    assert b.shape == (two_dout,)

    # pad rows to a multiple of the row tile (zeros; sliced off afterwards)
    n_tiles = pl.cdiv(rows, tile_rows)
    padded = n_tiles * tile_rows
    if padded != rows:
        x2d = jnp.pad(x2d, ((0, padded - rows), (0, 0)))

    # pack the two bias halves into one (2, dim_out) slab -> one operand, one DMA
    b2 = b.reshape(2, dim_out)

    grid_spec = pltpu.PrefetchScalarGridSpec(
        num_scalar_prefetch=0,
        grid=(n_tiles,),
        in_specs=[
            pl.BlockSpec((tile_rows, dim_in), lambda i: (i, 0)),   # row tile of x
            pl.BlockSpec((dim_in, two_dout), lambda i: (0, 0)),    # full weight, resident
            pl.BlockSpec((2, dim_out), lambda i: (0, 0)),          # packed biases, resident
        ],
        out_specs=pl.BlockSpec((tile_rows, dim_out), lambda i: (i, 0)),
    )

    # honest advisory cost hint
    flops = 2 * padded * dim_in * two_dout
    transcendentals = 2 * padded * dim_out                  # exp + reciprocal per gelu elem
    bytes_accessed = 4 * (padded * dim_in + dim_in * two_dout + two_dout + padded * dim_out)
    cost = pl.CostEstimate(flops=int(flops),
                           transcendentals=int(transcendentals),
                           bytes_accessed=int(bytes_accessed))

    out = pl.pallas_call(
        _geglu_kernel,
        out_shape=jax.ShapeDtypeStruct((padded, dim_out), jnp.float32),
        grid_spec=grid_spec,
        compiler_params=pltpu.CompilerParams(
            dimension_semantics=("parallel",)),                # megacore-shardable on v7x
        cost_estimate=cost,
    )(x2d, w, b2)

    return out[:rows]


if __name__ == "__main__":
    key = jax.random.PRNGKey(0)
    kx, kw, kb = jax.random.split(key, 3)

    # dense analogue of VDBTensor.feature.jdata: B grids x N_PTS points, DIM_IN channels
    x = jax.random.normal(kx, (B, N_PTS, DIM_IN), jnp.float32)
    x2d = x.reshape(B * N_PTS, DIM_IN)

    # proj = nn.Linear(dim_in, 2*dim_out); stored here as (dim_in, 2*dim_out) = W_torch.T
    w = 0.02 * jax.random.normal(kw, (DIM_IN, 2 * DIM_OUT), jnp.float32)
    b = 0.02 * jax.random.normal(kb, (2 * DIM_OUT,), jnp.float32)

    out = geglu(x2d, w, b)
    jax.block_until_ready(out)

    # reference (f32, exact erf gelu); bf16 MXU inputs -> relaxed tolerance
    proj = x2d @ w + b
    a_ref, gate_ref = proj[:, :DIM_OUT], proj[:, DIM_OUT:]
    ref = a_ref * jax.nn.gelu(gate_ref, approximate=False)

    assert out.shape == (B * N_PTS, DIM_OUT) and out.dtype == jnp.float32
    assert bool(jnp.all(jnp.isfinite(out)))
    assert bool(jnp.allclose(out, ref, atol=1e-2, rtol=1e-1))
    print("KERNEL_OK")
</pallas_src>

<mosaic_0001>
module attributes {stable_mosaic.version = 11 : i64} {
  func.func @_geglu_kernel(%arg0: i32, %arg1: memref<128x32xf32, #tpu.memory_space<vmem>>, %arg2: memref<32x256xf32, #tpu.memory_space<vmem>>, %arg3: memref<2x128xf32, #tpu.memory_space<vmem>>, %arg4: memref<128x128xf32, #tpu.memory_space<vmem>>) attributes {dimension_semantics = [#tpu.dimension_semantics<parallel>], iteration_bounds = array<i64: 2>, scalar_prefetch = 0 : i64, scratch_operands = 0 : i64, tpu.core_type = #tpu.core_type<tc>, window_params = [{transform_indices = @transform_0, window_bounds = array<i64: 128, 32>}, {pipeline_mode = #tpu.pipeline_mode<synchronous>, transform_indices = @transform_1, window_bounds = array<i64: 32, 256>}, {pipeline_mode = #tpu.pipeline_mode<synchronous>, transform_indices = @transform_2, window_bounds = array<i64: 2, 128>}, {transform_indices = @transform_3, window_bounds = array<i64: 128, 128>}]} {
    %c0 = arith.constant 0 : index
    %c0_0 = arith.constant 0 : index
    %0 = vector.load %arg1[%c0, %c0_0] : memref<128x32xf32, #tpu.memory_space<vmem>>, vector<128x32xf32>
    %1 = arith.truncf %0 : vector<128x32xf32> to vector<128x32xbf16>
    %c0_1 = arith.constant 0 : index
    %c0_2 = arith.constant 0 : index
    %2 = vector.load %arg2[%c0_1, %c0_2] : memref<32x256xf32, #tpu.memory_space<vmem>>, vector<32x256xf32>
    %3 = vector.extract_strided_slice %2 {offsets = [0, 128], sizes = [32, 128], strides = [1, 1]} : vector<32x256xf32> to vector<32x128xf32>
    %4 = arith.truncf %3 : vector<32x128xf32> to vector<32x128xbf16>
    %cst = arith.constant dense<0.000000e+00> : vector<128x128xf32>
    %5 = tpu.matmul %1, %4, %cst {dimension_numbers = #tpu.dot_dimension_numbers<[1], [0], [0], [1], [0, 0, 1, 1], [], []>} : vector<128x32xbf16>, vector<32x128xbf16>, vector<128x128xf32> -> vector<128x128xf32>
    %c1 = arith.constant 1 : index
    %c0_3 = arith.constant 0 : index
    %6 = vector.load %arg3[%c1, %c0_3] : memref<2x128xf32, #tpu.memory_space<vmem>>, vector<1x128xf32>
    %7 = vector.broadcast %6 : vector<1x128xf32> to vector<128x128xf32>
    %8 = arith.addf %5, %7 : vector<128x128xf32>
    %cst_4 = arith.constant 5.000000e-01 : f32
    %9 = vector.broadcast %cst_4 : f32 to vector<128x128xf32>
    %10 = arith.mulf %9, %8 : vector<128x128xf32>
    %cst_5 = arith.constant 0.707106769 : f32
    %11 = vector.broadcast %cst_5 : f32 to vector<128x128xf32>
    %12 = arith.mulf %8, %11 : vector<128x128xf32>
    %cst_6 = arith.constant 0.000000e+00 : f32
    %13 = vector.broadcast %cst_6 : f32 to vector<128x128xf32>
    %14 = arith.cmpf oge, %12, %13 : vector<128x128xf32>
    %cst_7 = arith.constant 1.000000e+00 : f32
    %cst_8 = arith.constant -1.000000e+00 : f32
    %15 = vector.broadcast %cst_7 : f32 to vector<128x128xf32>
    %16 = vector.broadcast %cst_8 : f32 to vector<128x128xf32>
    %17 = arith.select %14, %15, %16 : vector<128x128xi1>, vector<128x128xf32>
    %18 = math.absf %12 : vector<128x128xf32>
    %cst_9 = arith.constant 0.327591091 : f32
    %19 = vector.broadcast %cst_9 : f32 to vector<128x128xf32>
    %20 = arith.mulf %19, %18 : vector<128x128xf32>
    %cst_10 = arith.constant 1.000000e+00 : f32
    %21 = vector.broadcast %cst_10 : f32 to vector<128x128xf32>
    %22 = arith.addf %21, %20 : vector<128x128xf32>
    %23 = tpu.reciprocal %22 {approx = true} : vector<128x128xf32> -> vector<128x128xf32>
    %24 = arith.mulf %22, %23 : vector<128x128xf32>
    %cst_11 = arith.constant 2.000000e+00 : f32
    %25 = vector.broadcast %cst_11 : f32 to vector<128x128xf32>
    %26 = arith.subf %25, %24 : vector<128x128xf32>
    %27 = arith.mulf %23, %26 : vector<128x128xf32>
    %cst_12 = arith.constant 1.06140542 : f32
    %28 = vector.broadcast %cst_12 : f32 to vector<128x128xf32>
    %29 = arith.mulf %28, %27 : vector<128x128xf32>
    %cst_13 = arith.constant -1.45315206 : f32
    %30 = vector.broadcast %cst_13 : f32 to vector<128x128xf32>
    %31 = arith.addf %29, %30 : vector<128x128xf32>
    %32 = arith.mulf %31, %27 : vector<128x128xf32>
    %cst_14 = arith.constant 1.42141378 : f32
    %33 = vector.broadcast %cst_14 : f32 to vector<128x128xf32>
    %34 = arith.addf %32, %33 : vector<128x128xf32>
    %35 = arith.mulf %34, %27 : vector<128x128xf32>
    %cst_15 = arith.constant -0.284496725 : f32
    %36 = vector.broadcast %cst_15 : f32 to vector<128x128xf32>
    %37 = arith.addf %35, %36 : vector<128x128xf32>
    %38 = arith.mulf %37, %27 : vector<128x128xf32>
    %cst_16 = arith.constant 0.254829586 : f32
    %39 = vector.broadcast %cst_16 : f32 to vector<128x128xf32>
    %40 = arith.addf %38, %39 : vector<128x128xf32>
    %41 = arith.mulf %40, %27 : vector<128x128xf32>
    %cst_17 = arith.constant 0.000000e+00 : f32
    %42 = vector.broadcast %cst_17 : f32 to vector<128x128xf32>
    %43 = arith.subf %42, %18 : vector<128x128xf32>
    %44 = arith.mulf %43, %18 : vector<128x128xf32>
    %45 = math.exp %44 : vector<128x128xf32>
    %46 = arith.mulf %41, %45 : vector<128x128xf32>
    %cst_18 = arith.constant 1.000000e+00 : f32
    %47 = vector.broadcast %cst_18 : f32 to vector<128x128xf32>
    %48 = arith.subf %47, %46 : vector<128x128xf32>
    %49 = arith.mulf %17, %48 : vector<128x128xf32>
    %cst_19 = arith.constant 1.000000e+00 : f32
    %50 = vector.broadcast %cst_19 : f32 to vector<128x128xf32>
    %51 = arith.addf %50, %49 : vector<128x128xf32>
    %52 = arith.mulf %10, %51 : vector<128x128xf32>
    %53 = vector.extract_strided_slice %2 {offsets = [0, 0], sizes = [32, 128], strides = [1, 1]} : vector<32x256xf32> to vector<32x128xf32>
    %54 = arith.truncf %53 : vector<32x128xf32> to vector<32x128xbf16>
    %cst_20 = arith.constant dense<0.000000e+00> : vector<128x128xf32>
    %55 = tpu.matmul %1, %54, %cst_20 {dimension_numbers = #tpu.dot_dimension_numbers<[1], [0], [0], [1], [0, 0, 1, 1], [], []>} : vector<128x32xbf16>, vector<32x128xbf16>, vector<128x128xf32> -> vector<128x128xf32>
    %c0_21 = arith.constant 0 : index
    %c0_22 = arith.constant 0 : index
    %56 = vector.load %arg3[%c0_21, %c0_22] : memref<2x128xf32, #tpu.memory_space<vmem>>, vector<1x128xf32>
    %57 = vector.broadcast %56 : vector<1x128xf32> to vector<128x128xf32>
    %58 = arith.addf %55, %57 : vector<128x128xf32>
    %59 = arith.mulf %58, %52 : vector<128x128xf32>
    %c0_23 = arith.constant 0 : index
    %c0_24 = arith.constant 0 : index
    %60 = vector.load %arg4[%c0_23, %c0_24] : memref<128x128xf32, #tpu.memory_space<vmem>>, vector<128x128xf32>
    tpu.vector_store %arg4[%c0_23, %c0_24], %59 {strides = array<i32>} : memref<128x128xf32, #tpu.memory_space<vmem>>, vector<128x128xf32>,
    return
  }
  func.func @transform_0(%arg0: i32) -> (i32, i32) {
    %c0_i32 = arith.constant 0 : i32
    %c0_i32_0 = arith.constant 0 : i32
    return %arg0, %c0_i32 : i32, i32
  }
  func.func @transform_1(%arg0: i32) -> (i32, i32) {
    %c0_i32 = arith.constant 0 : i32
    %c0_i32_0 = arith.constant 0 : i32
    %c0_i32_1 = arith.constant 0 : i32
    return %c0_i32, %c0_i32_0 : i32, i32
  }
  func.func @transform_2(%arg0: i32) -> (i32, i32) {
    %c0_i32 = arith.constant 0 : i32
    %c0_i32_0 = arith.constant 0 : i32
    %c0_i32_1 = arith.constant 0 : i32
    return %c0_i32, %c0_i32_0 : i32, i32
  }
  func.func @transform_3(%arg0: i32) -> (i32, i32) {
    %c0_i32 = arith.constant 0 : i32
    %c0_i32_0 = arith.constant 0 : i32
    return %arg0, %c0_i32 : i32, i32
  }
}

</mosaic_0001>

<bundles_post_ra>
// kernel: tpu_custom_call.1
= control target key start
LH: loop header
LB: loop body
LE: loop exit
PB: predicated region body
PF: predicated region fallthrough
CT: control target
= control target key end

     0   :  { %8 = vsyncpa [#allocation3], 0  ;;  %s1931_s0 = inlined_call_operand.vmem [shape: f32[256,32], index: 0, kind: input, shape index: {}]   ;;  %s1932_s1 = inlined_call_operand.vmem [shape: f32[32,256], index: 1, kind: input, shape index: {}]   ;;  %s1933_s2 = inlined_call_operand.vmem [shape: f32[2,128], index: 2, kind: input, shape index: {}]   ;;  %s1934_s3 = inlined_call_operand.hbm [shape: f32[256,128], index: 3, kind: output, shape index: {}]  }
   0x1   :  { %10 = vsyncpa [#allocation3 + $0x1], 0  ;;  %s1294_s12 = smov 0   ;;  %s1296_s13 = smov 0  }
   0x2   :  { %s1298_s14 = smov 0   ;;  %s1300_s15 = smov 0  }
   0x3 LB: > { %s1315_s16 = sadd.s32 4294967295, %s1268_s15   ;;  %s1010_s17 = sadd.s32 4294967294, %s1268_s15   ;;  %s1268_s15 = sphi %s1300_s15, %s1943_s15   ;;  %s1264_s14 = sphi %s1298_s14, %s1942_s14   ;;  %s1260_s13 = sphi %s1296_s13, %s1941_s13   ;;  %s1256_s12 = sphi %s1294_s12, %s1940_s12  }
   0x4   : > { %s1319_s18 = sadd.s32 1, %s1268_s15   ;;  %s91_s19 = sadd.s32 1, %s1264_s14 }
   0x5   : > { %s88_s20 = ssub.s32 %s1268_s15, %s1319_s18  ;;  %p101_p0 = scmp.ne.s32.totalorder %s1264_s14, %s1260_s13 }
   0x6   : > { %p89_p1 = scmp.eq.s32.totalorder %s88_s20, 0  ;;  %p102_p2 = scmp.eq.s32.totalorder %s1315_s16, 1 }
   0x7   : > { %p107_p3 = scmp.ne.s32.totalorder %s1260_s13, %s1256_s12  ;;  %p108_p4 = scmp.eq.s32.totalorder %s1010_s17, 1 }
   0x8   : > { %s1330_s21 = scalar_select %p89_p1, %s1264_s14, %s91_s19  }
   0x9   : > { %p1332_p5 = por %p102_p2, %p101_p0  ;;  %p1336_p6 = por %p108_p4, %p107_p3 }
   0xa   : > { %p1013_p7 = scmp.ge.s32.totalorder %s1268_s15, 1  ;;  %p141_p8 = scmp.lt.s32.totalorder %s1268_s15, 3 }
   0xc   : > { %p142_p9 = pnand %p1013_p7, %p141_p8 }
   0xd   : > { %s1015_s30 = sshll.u32 (!%p142_p9), %s1315_s16, 4  ;;  %s162_s4 = sand.u32 (!%p142_p9), 1, %s1260_s13  }
   0xe   : > { %145 = sbr.rel (%p142_p9) target bundleno = 380 (0x17c), region = 32  ;;  %p166_p10 = scmp.lt.s32.totalorder (!%p142_p9), %s1015_s30, 31 }
   0xf   : > { %s1014_s5 = sshll.u32 (!%p142_p9), %s162_s4, 7  ;;  %s1040_s9 = sshll.u32 (!%p142_p9), %s1315_s16, 11 }
  0x10   : > { %s1749_s6 = scalar_lea.vmem (!%p142_p9), [#allocation2], %s1014_s5  ;;  %s1884_s19 = scalar_lea.hbm (!%p142_p9), %s1934_s3, %s1040_s9 }
  0x11   : > { %s948_s10 = sshll.u32 (!%p142_p9), %s1749_s6, 4  ;;  %s1271_s24 = smov (!%p142_p9), [#allocation2]   ;;  %s1886_s10 = int_to_ptr.vmem [resolvable:$true] %s948_s10 }
  0x12   : > { %s1208_s16 = scalar_lea.vmem (!%p142_p9), %s1886_s10, 2048  ;;  %s1212_s25 = sshll.u32 (!%p142_p9), %s1271_s24, 4  ;;  %s1213_s25 = int_to_ptr.vmem [resolvable:$false] %s1212_s25 }
  0x13   : > { %v202_v0 = vld [vmem:[%s1932_s1 + $0x28] sm:$0xff]  ;;  %v204_v1 = vld [vmem:[%s1932_s1 + $0x38] sm:$0xff]  ;;  %v201_v5 = vld [vmem:[%s1932_s1 + $0x20] sm:$0xff]  ;;  %s1945_s30 = smov (!%p166_p10, %s1015_s30), 31  ;;  %vm212_vm0 = vcmask 261120   ;;  %p1209_p11 = scmp.ne.s32.totalorder %s1886_s10, %s1208_s16 }
  0x14   : > { %v198_v2 = vld [vmem:[%s1932_s1 + $0x8] sm:$0xff]  ;;  %v206_v3 = vpack.c.bf16 %v204_v1, %v202_v0  ;;  %v200_v4 = vld [vmem:[%s1932_s1 + $0x18] sm:$0xff]  ;;  %v203_v6 = vld [vmem:[%s1932_s1 + $0x30] sm:$0xff]  ;;  %s1016_s20 = sshll.u32 %s1945_s30, 3  ;;  %p1215_p0 = scmp.lt.s32.totalorder %s1886_s10, %s1213_s25 }
  0x15   : > { %v205_v7 = vpack.c.bf16 %v200_v4, %v198_v2  ;;  %v799_v8 = vpack.c.bf16 %v203_v6, %v201_v5  ;;  %v197_v9 = vld [vmem:[%s1932_s1] sm:$0xff]  ;;  %v199_v10 = vld [vmem:[%s1932_s1 + $0x10] sm:$0xff]  ;;  %s1370_s26 = scalar_lea.vmem %s1931_s0, %s1016_s20  ;;  %s1891_s20 = scalar_lea.sflag [#allocation3], %s162_s4 }
  0x16   : > { %1061 = vmatprep.subr.bf16.mxu0 %v206_v3  ;;  %v798_v11 = vpack.c.bf16 %v199_v10, %v197_v9  ;;  %v173_v12 = vld [vmem:[%s1370_s26] sm:$0xff]  ;;  %v174_v13 = vld [vmem:[%s1370_s26 + $0x8] sm:$0xff]  ;;  %v175_v14 = vld [vmem:[%s1370_s26 + $0x10] sm:$0xff]  ;;  %p1210_p12 = pnand %p1209_p11, %p1332_p5 }
  0x17   : > { %1062 = vmatpush3.bf16.msra.mxu0 %v206_v3  ;;  %1081 = vmatprep.subr.bf16.mxu1 %v799_v8  ;;  %v189_v15 = vpack.c.bf16 %v174_v13, %v173_v12  ;;  %v176_v16 = vld [vmem:[%s1370_s26 + $0x18] sm:$0xff]  ;;  %v177_v17 = vld [vmem:[%s1370_s26 + $0x20] sm:$0xff]  ;;  %v178_v18 = vld [vmem:[%s1370_s26 + $0x28] sm:$0xff] }
  0x18   : > { %1063 = vmatprep.subr.bf16.mxu0 %v205_v7  ;;  %1082 = vmatpush3.bf16.msra.mxu1 %v799_v8  ;;  %v190_v19 = vpack.c.bf16 %v176_v16, %v175_v14  ;;  %v191_v20 = vpack.c.bf16 %v178_v18, %v177_v17  ;;  %v179_v21 = vld [vmem:[%s1370_s26 + $0x30] sm:$0xff]  ;;  %v180_v22 = vld [vmem:[%s1370_s26 + $0x38] sm:$0xff]  ;;  %v181_v23 = vld [vmem:[%s1370_s26 + $0x40] sm:$0xff]  ;;  %p1211_p13 = pneg %p1210_p12 }
  0x19   : > { %1083 = vmatprep.subr.bf16.mxu1 %v798_v11  ;;  %1065 = vmatprep.mubr.msk.bf16.mxu0 %vm212_vm0, %v189_v15  ;;  %v182_v24 = vld [vmem:[%s1370_s26 + $0x48] sm:$0xff]  ;;  %v192_v25 = vpack.c.bf16 %v180_v22, %v179_v21  ;;  %v183_v27 = vld [vmem:[%s1370_s26 + $0x50] sm:$0xff]  ;;  %v184_v28 = vld [vmem:[%s1370_s26 + $0x58] sm:$0xff] }
  0x1a   : > { %1085 = vmatprep.mubr.msk.bf16.mxu1 %vm212_vm0, %v189_v15  ;;  %v193_v26 = vpack.c.bf16 %v182_v24, %v181_v23  ;;  %v185_v29 = vld [vmem:[%s1370_s26 + $0x60] sm:$0xff]  ;;  %v186_v30 = vld [vmem:[%s1370_s26 + $0x68] sm:$0xff]  ;;  %v194_v31 = vpack.c.bf16 %v184_v28, %v183_v27  ;;  %v187_v33 = vld [vmem:[%s1370_s26 + $0x70] sm:$0xff] }
  0x1b   : > { %1064 = vmatpush3.bf16.msra.mxu0 %v205_v7  ;;  %v195_v32 = vpack.c.bf16 %v186_v30, %v185_v29  ;;  %v188_v34 = vld [vmem:[%s1370_s26 + $0x78] sm:$0xff]  ;;  %v1407_v36 = vld [vmem:[%s1933_s2 + $0x1] ss:$0 sm:$0xff]  ;;  %v1416_v53 = vld [vmem:[%s1933_s2] ss:$0 sm:$0xff]  ;;  %s1214_s26 = scalar_lea.vmem %s1213_s25, 4096 }
  0x1c   : > { %1084 = vmatpush3.bf16.msra.mxu1 %v798_v11  ;;  %v196_v35 = vpack.c.bf16 %v188_v34, %v187_v33  ;;  %v1935_v11 = vmov -1.0   ;;  %p1216_p1 = scmp.lt.s32.totalorder %s1214_s26, %s1208_s16 }
  0x1e   : > { %1066 = vmatmul.mubr.msk.bf16.vlgmr.msra.gmra.mxu0 %vm212_vm0, %v190_v19  ;;  %p1217_p2 = por %p1216_p1, %p1215_p0 }
  0x1f   : > { %1069 = vmatprep.mubr.msk.bf16.mxu0 %vm212_vm0, %v191_v20  ;;  %1086 = vmatmul.mubr.msk.bf16.vlgmr.msra.gmra.mxu1 %vm212_vm0, %v190_v19 }
  0x20   : > { %1089 = vmatprep.mubr.msk.bf16.mxu1 %vm212_vm0, %v191_v20  ;;  %p1218_p3 = pnand %p1217_p2, %p1211_p13 }
  0x26   : > { %1070 = vmatmul.mubr.msk.bf16.gmra.mxu0 %vm212_vm0, %v192_v25 }
  0x27   : > { %1073 = vmatprep.mubr.msk.bf16.mxu0 %vm212_vm0, %v193_v26  ;;  %1090 = vmatmul.mubr.msk.bf16.gmra.mxu1 %vm212_vm0, %v192_v25 }
  0x28   : > { %1093 = vmatprep.mubr.msk.bf16.mxu1 %vm212_vm0, %v193_v26 }
  0x2e   : > { %1074 = vmatmul.mubr.msk.bf16.gmra.mxu0 %vm212_vm0, %v194_v31 }
  0x2f   : > { %1077 = vmatprep.mubr.msk.bf16.mxu0 %vm212_vm0, %v195_v32  ;;  %1094 = vmatmul.mubr.msk.bf16.gmra.mxu1 %vm212_vm0, %v194_v31 }
  0x30   : > { %1097 = vmatprep.mubr.msk.bf16.mxu1 %vm212_vm0, %v195_v32 }
  0x36   : > { %1078 = vmatmul.mubr.msk.bf16.gmra.mxu0 %vm212_vm0, %v196_v35 }
  0x37   : > { %1098 = vmatmul.mubr.msk.bf16.gmra.mxu1 %vm212_vm0, %v196_v35 }
  0xde   : > { %v1067_v37 = vpop.f32.mrf.mxu0 }
  0xdf   : > { %v280_v38 = vadd.f32 %v1067_v37, %v1407_v36  ;;  %v1087_v49 = vpop.f32.mrf.mxu1 }
  0xe0   : > { %v271_v39 = vpop.f32.mrf.mxu0  ;;  %v1424_v62 = vadd.f32 %v1087_v49, %v1416_v53 }
  0xe1   : > { %v352_v40 = vmul.f32 0.70710677, %v280_v38  ;;  %v272_v41 = vadd.f32 %v1407_v36, %v271_v39  ;;  %v839_v63 = vpop.f32.mrf.mxu1  ;;  %v1426_v0 = vmul.f32 0.5, %v280_v38 }
  0xe2   : > { %v1068_v42 = vpop.f32.mrf.mxu0  ;;  %v1429_v2 = vadd.f32 %v1416_v53, %v839_v63 }
  0xe3   : > { %v400_v43 = vand.u32 2147483647, %v352_v40  ;;  %v350_v44 = vmul.f32 0.70710677, %v272_v41  ;;  %v283_v45 = vadd.f32 %v1068_v42, %v1407_v36  ;;  %vm368_vm1 = vcmp.ge.f32.partialorder %v352_v40, 0.0 }
  0xe4   : > { %v274_v46 = vpop.f32.mrf.mxu0  ;;  %v1431_v4 = vmul.f32 0.5, %v272_v41  ;;  %v1438_v12 = vsel %vm368_vm1, 1.0, %v1935_v11 }
  0xe5   : > { %v416_v47 = vmul.f32 0.3275911, %v400_v43  ;;  %v398_v48 = vand.u32 2147483647, %v350_v44  ;;  %v353_v50 = vmul.f32 0.70710677, %v283_v45  ;;  %v275_v51 = vadd.f32 %v1407_v36, %v274_v46 }
  0xe6   : > { %v1071_v52 = vpop.f32.mrf.mxu0  ;;  %v656_v55 = vsub.f32 0.0, %v400_v43  ;;  %vm366_vm2 = vcmp.ge.f32.partialorder %v350_v44, 0.0  ;;  %v1449_v26 = vmul.f32 0.5, %v283_v45 }
  0xe7   : > { %v1418_v54 = vadd.f32 1.0, %v416_v47  ;;  %v414_v56 = vmul.f32 0.3275911, %v398_v48  ;;  %v654_v57 = vsub.f32 0.0, %v398_v48  ;;  %v401_v58 = vand.u32 2147483647, %v353_v50 }
  0xe8   : > { %v351_v59 = vmul.f32 0.70710677, %v275_v51  ;;  %v287_v60 = vpop.f32.mrf.mxu0  ;;  %v672_v3 = vmul.f32 %v656_v55, %v400_v43  ;;  %v296_v9 = vadd.f32 %v1071_v52, %v1407_v36  ;;  %vm369_vm3 = vcmp.ge.f32.partialorder %v353_v50, 0.0 }
  0xe9   : > { %1143 = vrcp.f32 %v1418_v54  ;;  %v1421_v61 = vadd.f32 1.0, %v414_v56  ;;  %v417_v1 = vmul.f32 0.3275911, %v401_v58  ;;  %v670_v5 = vmul.f32 %v654_v57, %v398_v48 }
  0xea   : > { %v399_v6 = vand.u32 2147483647, %v351_v59  ;;  %v657_v8 = vsub.f32 0.0, %v401_v58  ;;  %v1072_v10 = vpop.f32.mrf.mxu0  ;;  %v288_v14 = vadd.f32 %v1407_v36, %v287_v60  ;;  %v356_v16 = vmul.f32 0.70710677, %v296_v9 }
  0xeb   : > { %1145 = vrcp.f32 %v1421_v61  ;;  %v1434_v7 = vadd.f32 1.0, %v417_v1  ;;  %v690_v17 = vmul.f32 1.442695, %v672_v3  ;;  %vm367_vm4 = vcmp.ge.f32.partialorder %v351_v59, 0.0 }
  0xec   : > { %v415_v13 = vmul.f32 0.3275911, %v399_v6  ;;  %v655_v15 = vsub.f32 0.0, %v399_v6  ;;  %v354_v19 = vmul.f32 0.70710677, %v288_v14  ;;  %v673_v21 = vmul.f32 %v657_v8, %v401_v58  ;;  %v290_v24 = vpop.f32.mrf.mxu0 }
  0xed   : > { %1147 = vrcp.f32 %v1434_v7  ;;  %v686_v20 = vmul.f32 1.442695, %v670_v5  ;;  %v404_v22 = vand.u32 2147483647, %v356_v16  ;;  %v299_v23 = vadd.f32 %v1072_v10, %v1407_v36 }
  0xee   : > { %v1442_v18 = vadd.f32 1.0, %v415_v13  ;;  %v1447_v25 = vsel %vm366_vm2, 1.0, %v1935_v11  ;;  %v1451_v27 = vmul.f32 0.5, %v275_v51  ;;  %v1456_v28 = vsel %vm369_vm3, 1.0, %v1935_v11 }
  0xef   : > { %v671_v29 = vmul.f32 %v655_v15, %v399_v6  ;;  %v420_v30 = vmul.f32 0.3275911, %v404_v22  ;;  %v402_v31 = vand.u32 2147483647, %v354_v19  ;;  %v1460_v32 = vsel %vm367_vm4, 1.0, %v1935_v11 }
  0xf0   : > { %1149 = vrcp.f32 %v1442_v18  ;;  %v357_v33 = vmul.f32 0.70710677, %v299_v23  ;;  %v291_v34 = vadd.f32 %v1407_v36, %v290_v24  ;;  %v692_v35 = vmul.f32 1.442695, %v673_v21 }
  0xf1   : > { %1151 = vpow2.f32 %v690_v17  ;;  %v1463_v37 = vadd.f32 1.0, %v420_v30  ;;  %v418_v38 = vmul.f32 0.3275911, %v402_v31  ;;  %v1465_v39 = vmul.f32 0.5, %v296_v9 }
  0xf2   : > { %1153 = vpow2.f32 %v686_v20  ;;  %vm372_vm5 = vcmp.ge.f32.partialorder %v356_v16, 0.0  ;;  %v405_v40 = vand.u32 2147483647, %v357_v33  ;;  %v1467_v41 = vmul.f32 0.70710677, %v291_v34 }
  0xf3   : > { %v688_v43 = vmul.f32 1.442695, %v671_v29  ;;  %1155 = vrcp.f32 %v1463_v37  ;;  %v660_v44 = vsub.f32 0.0, %v404_v22  ;;  %v1470_v45 = vadd.f32 1.0, %v418_v38 }
  0xf4   : > { %v1473_v47 = vmul.f32 0.5, %v288_v14  ;;  %v658_v48 = vsub.f32 0.0, %v402_v31  ;;  %v421_v49 = vmul.f32 0.3275911, %v405_v40  ;;  %1157 = vpow2.f32 %v692_v35 }
  0xf5   : > { %v1476_v50 = vsel %vm372_vm5, 1.0, %v1935_v11  ;;  %vm370_vm6 = vcmp.ge.f32.partialorder %v354_v19, 0.0  ;;  %v1479_v51 = vand.u32 2147483647, %v1467_v41  ;;  %1159 = vrcp.f32 %v1470_v45 }
  0xf6   : > { %v1144_v42 = vpop.eup %1143  ;;  %v1482_v56 = vadd.f32 1.0, %v421_v49  ;;  %v661_v57 = vsub.f32 0.0, %v405_v40  ;;  %1161 = vpow2.f32 %v688_v43  ;;  %v676_v59 = vmul.f32 %v660_v44, %v404_v22 }
  0xf7   : > { %v464_v46 = vmul.f32 %v1144_v42, %v1418_v54  ;;  %v1075_v54 = vpop.f32.mrf.mxu0  ;;  %v419_v60 = vmul.f32 0.3275911, %v1479_v51  ;;  %v1489_v3 = vsel %vm370_vm6, 1.0, %v1935_v11  ;;  %v674_v5 = vmul.f32 %v658_v48, %v402_v31 }
  0xf8   : > { %v1146_v52 = vpop.eup %1145  ;;  %1163 = vrcp.f32 %v1482_v56  ;;  %v1497_v13 = vmul.f32 0.5, %v299_v23  ;;  %vm373_vm7 = vcmp.ge.f32.partialorder %v357_v33, 0.0  ;;  %v677_v14 = vmul.f32 %v661_v57, %v405_v40 }
  0xf9   : > { %v480_v55 = vsub.f32 2.0, %v464_v46  ;;  %v462_v58 = vmul.f32 %v1146_v52, %v1421_v61  ;;  %v1493_v9 = vadd.f32 1.0, %v419_v60  ;;  %v312_v61 = vadd.f32 %v1075_v54, %v1407_v36  ;;  %v303_v57 = vpop.f32.mrf.mxu0 }
  0xfa   : > { %v1148_v63 = vpop.eup %1147  ;;  %v698_v19 = vmul.f32 1.442695, %v676_v59  ;;  %v694_v21 = vmul.f32 1.442695, %v674_v5  ;;  %v1511_v30 = vsel %vm373_vm7, 1.0, %v1935_v11  ;;  %v1513_v31 = vmul.f32 0.5, %v291_v34 }
  0xfb   : > { %v1486_v1 = vmul.f32 %v1144_v42, %v480_v55  ;;  %v478_v6 = vsub.f32 2.0, %v462_v58  ;;  %v465_v8 = vmul.f32 %v1148_v63, %v1434_v7  ;;  %1165 = vrcp.f32 %v1493_v9 }
  0xfc   : > { %v1503_v22 = vmul.f32 0.70710677, %v312_v61  ;;  %vm371_vm8 = vcmp.ge.f32.partialorder %v1467_v41, 0.0  ;;  %1167 = vpow2.f32 %v698_v19  ;;  %v659_v43 = vsub.f32 0.0, %v1479_v51 }
  0xfd   : > { %v512_v10 = vmul.f32 1.0614054, %v1486_v1  ;;  %v1150_v15 = vpop.eup %1149  ;;  %v1499_v16 = vmul.f32 %v1146_v52, %v478_v6  ;;  %v481_v17 = vsub.f32 2.0, %v465_v8  ;;  %1169 = vpow2.f32 %v694_v21 }
  0xfe   : > { %v463_v7 = vmul.f32 %v1150_v15, %v1442_v18  ;;  %v1505_v24 = vpop.eup %1151  ;;  %v700_v18 = vmul.f32 1.442695, %v677_v14  ;;  %v1524_v34 = vand.u32 2147483647, %v1503_v22  ;;  %v1529_v41 = vsel %vm371_vm8, 1.0, %v1935_v11 }
  0xff   : > { %v528_v20 = vadd.f32 -1.4531521, %v512_v10  ;;  %v510_v23 = vmul.f32 1.0614054, %v1499_v16  ;;  %v1508_v29 = vmul.f32 %v1148_v63, %v481_v17  ;;  %v1515_v33 = vpop.eup %1153  ;;  %v304_v19 = vadd.f32 %v1407_v36, %v303_v57 }
 0x100   : > { %v479_v38 = vsub.f32 2.0, %v463_v7  ;;  %v1156_v44 = vpop.eup %1155  ;;  %1171 = vpow2.f32 %v700_v18  ;;  %v424_v60 = vmul.f32 0.3275911, %v1524_v34  ;;  %vm376_vm9 = vcmp.ge.f32.partialorder %v1503_v22, 0.0 }
 0x101   : > { %v544_v35 = vmul.f32 %v528_v20, %v1486_v1  ;;  %v526_v40 = vadd.f32 -1.4531521, %v510_v23  ;;  %v513_v42 = vmul.f32 1.0614054, %v1508_v29  ;;  %v468_v55 = vmul.f32 %v1156_v44, %v1463_v37  ;;  %v1531_v54 = vpop.eup %1157 }
 0x102   : > { %v1521_v48 = vmul.f32 %v1150_v15, %v479_v38  ;;  %v1160_v63 = vpop.eup %1159  ;;  %v675_v37 = vmul.f32 %v659_v43, %v1479_v51  ;;  %v1541_v17 = vadd.f32 1.0, %v424_v60 }
 0x103   : > { %v560_v46 = vadd.f32 1.4214138, %v544_v35  ;;  %v542_v49 = vmul.f32 %v526_v40, %v1499_v16  ;;  %v529_v52 = vadd.f32 -1.4531521, %v513_v42  ;;  %v484_v8 = vsub.f32 2.0, %v468_v55  ;;  %v1538_v10 = vpop.eup %1161 }
 0x104   : > { %v511_v59 = vmul.f32 1.0614054, %v1521_v48  ;;  %v466_v15 = vmul.f32 %v1160_v63, %v1470_v45  ;;  %v1547_v35 = vmul.f32 0.5, %v312_v61  ;;  %1173 = vrcp.f32 %v1541_v17 }
 0x105   : > { %v576_v58 = vmul.f32 %v560_v46, %v1486_v1  ;;  %v558_v5 = vadd.f32 1.4214138, %v542_v49  ;;  %v545_v6 = vmul.f32 %v529_v52, %v1508_v29  ;;  %v1164_v20 = vpop.eup %1163  ;;  %v1545_v23 = vmul.f32 %v1156_v44, %v484_v8 }
 0x106   : > { %v527_v14 = vadd.f32 -1.4531521, %v511_v59  ;;  %v482_v18 = vsub.f32 2.0, %v466_v15  ;;  %v469_v40 = vmul.f32 %v1164_v20, %v1482_v56  ;;  %v696_v61 = vmul.f32 1.442695, %v675_v37 }
 0x107   : > { %v574_v7 = vmul.f32 %v558_v5, %v1499_v16  ;;  %v561_v21 = vadd.f32 1.4214138, %v545_v6  ;;  %v592_v38 = vadd.f32 -0.28449672, %v576_v58  ;;  %v516_v43 = vmul.f32 1.0614054, %v1545_v23 }
 0x108   : > { %v543_v51 = vmul.f32 %v527_v14, %v1521_v48  ;;  %v1166_v46 = vpop.eup %1165  ;;  %v1554_v52 = vmul.f32 %v1160_v63, %v482_v18  ;;  %v485_v44 = vsub.f32 2.0, %v469_v40  ;;  %v1557_v59 = vmul.f32 0.70710677, %v304_v19 }
 0x109   : > { %v590_v42 = vadd.f32 -0.28449672, %v574_v7  ;;  %v577_v45 = vmul.f32 %v561_v21, %v1508_v29  ;;  %v532_v57 = vadd.f32 -1.4531521, %v516_v43  ;;  %v467_v58 = vmul.f32 %v1166_v46, %v1493_v9  ;;  %v1567_v37 = vpop.eup %1167 }
 0x10a   : > { %v559_v49 = vadd.f32 1.4214138, %v543_v51  ;;  %v608_v56 = vmul.f32 %v592_v38, %v1486_v1  ;;  %v514_v5 = vmul.f32 1.0614054, %v1554_v52  ;;  %v1562_v6 = vmul.f32 %v1164_v20, %v485_v44  ;;  %v1571_v38 = vpop.eup %1169 }
 0x10b   : > { %v593_v55 = vadd.f32 -0.28449672, %v577_v45  ;;  %v606_v8 = vmul.f32 %v590_v42, %v1499_v16  ;;  %v548_v63 = vmul.f32 %v532_v57, %v1545_v23  ;;  %v483_v14 = vsub.f32 2.0, %v467_v58 }
 0x10c   : > { %v575_v60 = vmul.f32 %v559_v49, %v1521_v48  ;;  %v530_v7 = vadd.f32 -1.4531521, %v514_v5  ;;  %v517_v21 = vmul.f32 1.0614054, %v1562_v6  ;;  %v1575_v18 = vmul.f32 0.5, %v304_v19 }
 0x10d   : > { %v609_v9 = vmul.f32 %v593_v55, %v1508_v29  ;;  %v564_v51 = vadd.f32 1.4214138, %v548_v63  ;;  %v1573_v20 = vmul.f32 %v1166_v46, %v483_v14  ;;  %v406_v40 = vand.u32 2147483647, %v1557_v59  ;;  %v1580_v44 = vpop.eup %1171 }
 0x10e   : > { %v591_v15 = vadd.f32 -0.28449672, %v575_v60  ;;  %v624_v42 = vadd.f32 0.2548296, %v608_v56  ;;  %v546_v43 = vmul.f32 %v530_v7, %v1554_v52  ;;  %v533_v49 = vadd.f32 -1.4531521, %v517_v21 }
 0x10f   : > { %v622_v55 = vadd.f32 0.2548296, %v606_v8  ;;  %v580_v57 = vmul.f32 %v564_v51, %v1545_v23  ;;  %v515_v58 = vmul.f32 1.0614054, %v1573_v20  ;;  %v1587_v19 = vsel %vm376_vm9, 1.0, %v1935_v11 }
 0x110   : > { %v607_v45 = vmul.f32 %v591_v15, %v1521_v48  ;;  %v625_v46 = vadd.f32 0.2548296, %v609_v9  ;;  %v562_v60 = vadd.f32 1.4214138, %v546_v43  ;;  %v549_v56 = vmul.f32 %v533_v49, %v1562_v6 }
 0x111   : > { %v664_v5 = vsub.f32 0.0, %v1524_v34  ;;  %v596_v14 = vadd.f32 -0.28449672, %v580_v57  ;;  %v531_v15 = vadd.f32 -1.4531521, %v515_v58  ;;  %1175 = vpow2.f32 %v696_v61  ;;  %v1174_v43 = vpop.eup %1173 }
 0x112   : > { %v623_v63 = vadd.f32 0.2548296, %v607_v45  ;;  %v640_v8 = vmul.f32 %v624_v42, %v1486_v1  ;;  %v578_v7 = vmul.f32 %v562_v60, %v1554_v52  ;;  %v565_v21 = vadd.f32 1.4214138, %v549_v56  ;;  %v1076_v42 = vpop.f32.mrf.mxu0 }
 0x113   : > { %v422_v51 = vmul.f32 0.3275911, %v406_v40  ;;  %v638_v22 = vmul.f32 %v622_v55, %v1499_v16  ;;  %v612_v11 = vmul.f32 %v596_v14, %v1545_v23  ;;  %v547_v9 = vmul.f32 %v531_v15, %v1573_v20 }
 0x114   : > { %vm374_vm10 = vcmp.ge.f32.partialorder %v1557_v59, 0.0  ;;  %v641_v45 = vmul.f32 %v625_v46, %v1508_v29  ;;  %v594_v49 = vadd.f32 -0.28449672, %v578_v7  ;;  %v581_v61 = vmul.f32 %v565_v21, %v1562_v6 }
 0x115   : > { %v680_v1 = vmul.f32 %v664_v5, %v1524_v34  ;;  %v639_v57 = vmul.f32 %v623_v63, %v1521_v48  ;;  %v628_v58 = vadd.f32 0.2548296, %v612_v11  ;;  %v563_v60 = vadd.f32 1.4214138, %v547_v9 }
 0x116   : > { %v472_v16 = vmul.f32 %v1174_v43, %v1541_v17  ;;  %v720_v55 = vmul.f32 %v1505_v24, %v640_v8  ;;  %v610_v56 = vmul.f32 %v594_v49, %v1554_v52  ;;  %v597_v14 = vadd.f32 -0.28449672, %v581_v61  ;;  %v306_v24 = vpop.f32.mrf.mxu0 }
 0x117   : > { %v1604_v15 = vadd.f32 1.0, %v422_v51  ;;  %v718_v29 = vmul.f32 %v1515_v33, %v638_v22  ;;  %v579_v46 = vmul.f32 %v563_v60, %v1573_v20  ;;  %v662_v34 = vsub.f32 0.0, %v406_v40 }
 0x118   : > { %v488_v7 = vsub.f32 2.0, %v472_v16  ;;  %v721_v5 = vmul.f32 %v1531_v54, %v641_v45  ;;  %v644_v11 = vmul.f32 %v628_v58, %v1545_v23  ;;  %v613_v48 = vmul.f32 %v597_v14, %v1562_v6  ;;  %v1079_v60 = vpop.f32.mrf.mxu0 }
 0x119   : > { %1177 = vrcp.f32 %v1604_v15  ;;  %v719_v17 = vmul.f32 %v1538_v10, %v639_v57  ;;  %v626_v63 = vadd.f32 0.2548296, %v610_v56  ;;  %v595_v8 = vadd.f32 -0.28449672, %v579_v46 }
 0x11a   : > { %v1613_v21 = vmul.f32 %v1174_v43, %v488_v7  ;;  %v736_v33 = vsub.f32 1.0, %v720_v55  ;;  %v1939_v51 = vmov -1.0   ;;  %v678_v54 = vmul.f32 %v662_v34, %v406_v40 }
 0x11b   : > { %v1618_v22 = vsel %vm374_vm10, 1.0, %v1939_v51  ;;  %v315_v23 = vadd.f32 %v1076_v42, %v1407_v36  ;;  %v734_v9 = vsub.f32 1.0, %v718_v29  ;;  %v611_v45 = vmul.f32 %v595_v8, %v1573_v20  ;;  %v1088_v42 = vpop.f32.mrf.mxu1 }
 0x11c   : > { %v520_v49 = vmul.f32 1.0614054, %v1613_v21  ;;  %v706_v61 = vmul.f32 1.442695, %v680_v1  ;;  %v737_v10 = vsub.f32 1.0, %v721_v5  ;;  %v724_v57 = vmul.f32 %v1567_v37, %v644_v11 }
 0x11d   : > { %v629_v43 = vadd.f32 0.2548296, %v613_v48  ;;  %v361_v58 = vmul.f32 0.70710677, %v315_v23  ;;  %v735_v16 = vsub.f32 1.0, %v719_v17  ;;  %v642_v59 = vmul.f32 %v626_v63, %v1554_v52 }
 0x11e   : > { %v536_v55 = vadd.f32 -1.4531521, %v520_v49  ;;  %v1626_v40 = vadd.f32 %v1407_v36, %v306_v24  ;;  %v1176_v56 = vpop.eup %1175  ;;  %v627_v14 = vadd.f32 0.2548296, %v611_v45  ;;  %v702_v29 = vmul.f32 1.442695, %v678_v54  ;;  %v319_v24 = vpop.f32.mrf.mxu0 }
 0x11f   : > { %v409_v46 = vand.u32 2147483647, %v361_v58  ;;  %v1629_v1 = vadd.f32 %v1088_v42, %v1416_v53  ;;  %v1632_v37 = vmul.f32 %v736_v33, %v1438_v12  ;;  %v1635_v7 = vmul.f32 %v734_v9, %v1447_v25 }
 0x120   : > { %v552_v52 = vmul.f32 %v536_v55, %v1613_v21  ;;  %1179 = vpow2.f32 %v706_v61  ;;  %v1639_v34 = vmul.f32 %v737_v10, %v1456_v28  ;;  %v740_v5 = vsub.f32 1.0, %v724_v57 }
 0x121   : > { %v645_v11 = vmul.f32 %v629_v43, %v1562_v6  ;;  %v425_v48 = vmul.f32 0.3275911, %v409_v46  ;;  %v1643_v17 = vmul.f32 %v735_v16, %v1460_v32  ;;  %v722_v12 = vmul.f32 %v1571_v38, %v642_v59 }
 0x122   : > { %v568_v63 = vadd.f32 1.4214138, %v552_v52  ;;  %v1647_v25 = vmul.f32 0.70710677, %v1626_v40  ;;  %v643_v8 = vmul.f32 %v627_v14, %v1573_v20  ;;  %1181 = vpow2.f32 %v702_v29 }
 0x123   : > { %v1650_v33 = vadd.f32 1.0, %v425_v48  ;;  %v1653_v28 = vadd.f32 %v1079_v60, %v1407_v36  ;;  %v665_v54 = vsub.f32 0.0, %v409_v46  ;;  %v1658_v9 = vadd.f32 %v1407_v36, %v319_v24 }
 0x124   : > { %v584_v6 = vmul.f32 %v568_v63, %v1613_v21  ;;  %v407_v32 = vand.u32 2147483647, %v1647_v25  ;;  %v1661_v38 = vmul.f32 %v740_v5, %v1476_v50  ;;  %v725_v45 = vmul.f32 %v1580_v44, %v645_v11  ;;  %v1080_v50 = vpop.f32.mrf.mxu0 }
 0x125   : > { %v1664_v20 = vmul.f32 0.5, %v315_v23  ;;  %1183 = vrcp.f32 %v1650_v33  ;;  %vm377_vm11 = vcmp.ge.f32.partialorder %v361_v58, 0.0  ;;  %v738_v43 = vsub.f32 1.0, %v722_v12 }
 0x126   : > { %v1178_v49 = vpop.eup %1177  ;;  %v600_v61 = vadd.f32 -0.28449672, %v584_v6  ;;  %v423_v10 = vmul.f32 0.3275911, %v407_v32  ;;  %v663_v57 = vsub.f32 0.0, %v407_v32  ;;  %v723_v60 = vmul.f32 %v1176_v56, %v643_v8 }
 0x127   : > { %v470_v16 = vmul.f32 %v1178_v49, %v1604_v15  ;;  %v1669_v59 = vmul.f32 0.70710677, %v1653_v28  ;;  %v681_v44 = vmul.f32 %v665_v54, %v409_v46  ;;  %v1675_v42 = vmul.f32 0.70710677, %v1658_v9 }
 0x128   : > { %v616_v55 = vmul.f32 %v600_v61, %v1613_v21  ;;  %v1672_v23 = vadd.f32 1.0, %v423_v10  ;;  %v1678_v58 = vsel %vm377_vm11, 1.0, %v1939_v51  ;;  %v679_v29 = vmul.f32 %v663_v57, %v407_v32  ;;  %v322_v10 = vpop.f32.mrf.mxu0 }
 0x129   : > { %v486_v14 = vsub.f32 2.0, %v470_v16  ;;  %v412_v56 = vand.u32 2147483647, %v1669_v59  ;;  %v741_v15 = vsub.f32 1.0, %v725_v45  ;;  %v1683_v5 = vadd.f32 %v1080_v50, %v1407_v36 }
 0x12a   : > { %v632_v52 = vadd.f32 0.2548296, %v616_v55  ;;  %1185 = vrcp.f32 %v1672_v23  ;;  %v739_v46 = vsub.f32 1.0, %v723_v60  ;;  %v708_v63 = vmul.f32 1.442695, %v681_v44 }
 0x12b   : > { %v1685_v11 = vmul.f32 %v1178_v49, %v486_v14  ;;  %v428_v48 = vmul.f32 0.3275911, %v412_v56  ;;  %v668_v24 = vsub.f32 0.0, %v412_v56  ;;  %vm375_vm12 = vcmp.ge.f32.partialorder %v1647_v25, 0.0 }
 0x12c   : > { %v648_v12 = vmul.f32 %v632_v52, %v1613_v21  ;;  %v410_v8 = vand.u32 2147483647, %v1675_v42  ;;  %v704_v32 = vmul.f32 1.442695, %v679_v29  ;;  %v1696_v16 = vmul.f32 0.70710677, %v1683_v5 }
 0x12d   : > { %v1180_v6 = vpop.eup %1179  ;;  %v518_v54 = vmul.f32 1.0614054, %v1685_v11  ;;  %v1691_v45 = vadd.f32 1.0, %v428_v48  ;;  %v684_v61 = vmul.f32 %v668_v24, %v412_v56  ;;  %v1699_v21 = vmul.f32 %v738_v43, %v1489_v3 }
 0x12e   : > { %v1693_v57 = vmul.f32 %v1180_v6, %v648_v12  ;;  %v426_v49 = vmul.f32 0.3275911, %v410_v8  ;;  %v666_v60 = vsub.f32 0.0, %v410_v8  ;;  %v1702_v50 = vmul.f32 %v741_v15, %v1511_v30 }
 0x12f   : > { %v534_v55 = vadd.f32 -1.4531521, %v518_v54  ;;  %1187 = vrcp.f32 %v1691_v45  ;;  %v1705_v44 = vpop.eup %1181  ;;  %v1710_v56 = vadd.f32 %v1407_v36, %v322_v10  ;;  %v1716_v3 = vsel %vm375_vm12, 1.0, %v1939_v51 }
 0x130   : > { %1189 = vpow2.f32 %v708_v63  ;;  %v1707_v14 = vadd.f32 1.0, %v426_v49  ;;  %v682_v29 = vmul.f32 %v666_v60, %v410_v8  ;;  %v413_v30 = vand.u32 2147483647, %v1696_v16 }
 0x131   : > { %v550_v52 = vmul.f32 %v534_v55, %v1685_v11  ;;  %1191 = vpow2.f32 %v704_v32  ;;  %v1720_v15 = vmul.f32 %v739_v46, %v1529_v41  ;;  %v744_v48 = vsub.f32 1.0, %v1693_v57  ;;  %v842_v57 = vpop.f32.mrf.mxu1 }
 0x132   : > { %v1184_v43 = vpop.eup %1183  ;;  %v714_v24 = vmul.f32 1.442695, %v684_v61  ;;  %1193 = vrcp.f32 %v1707_v14  ;;  %v429_v25 = vmul.f32 0.3275911, %v413_v30  ;;  %v669_v63 = vsub.f32 0.0, %v413_v30 }
 0x133   : > { %v566_v36 = vadd.f32 1.4214138, %v550_v52  ;;  %v473_v12 = vmul.f32 %v1184_v43, %v1650_v33  ;;  %v710_v8 = vmul.f32 1.442695, %v682_v29  ;;  %v1727_v6 = vmul.f32 0.70710677, %v1710_v56 }
 0x134   : > { %v768_v54 = vadd.f32 1.0, %v1632_v37  ;;  %v766_v41 = vadd.f32 1.0, %v1635_v7  ;;  %v1732_v61 = vadd.f32 1.0, %v429_v25  ;;  %v685_v10 = vmul.f32 %v669_v63, %v413_v30 }
 0x135   : > { %v582_v46 = vmul.f32 %v566_v36, %v1685_v11  ;;  %v489_v32 = vsub.f32 2.0, %v473_v12  ;;  %1195 = vpow2.f32 %v714_v24  ;;  %v411_v33 = vand.u32 2147483647, %v1727_v6 }
 0x136   : > { %v784_v49 = vmul.f32 %v768_v54, %v1426_v0  ;;  %v782_v60 = vmul.f32 %v766_v41, %v1431_v4  ;;  %1197 = vrcp.f32 %v1732_v61  ;;  %v716_v7 = vmul.f32 1.442695, %v685_v10  ;;  %v1091_v4 = vpop.f32.mrf.mxu1 }
 0x137   : > { %v1186_v55 = vpop.eup %1185  ;;  %v598_v37 = vadd.f32 -0.28449672, %v582_v46  ;;  %v1739_v29 = vmul.f32 %v1184_v43, %v489_v32  ;;  %1199 = vpow2.f32 %v710_v8  ;;  %v427_v30 = vmul.f32 0.3275911, %v411_v33 }
 0x138   : > { %v471_v52 = vmul.f32 %v1186_v55, %v1672_v23  ;;  %v667_v36 = vsub.f32 0.0, %v411_v33  ;;  %1201 = vpow2.f32 %v716_v7  ;;  %v904_v0 = vmul.f32 %v1424_v62, %v784_v49 }
 0x139   : > { %v614_v24 = vmul.f32 %v598_v37, %v1685_v11  ;;  %v521_v12 = vmul.f32 1.0614054, %v1739_v29  ;;  %v1746_v63 = vadd.f32 1.0, %v427_v30  ;;  %v902_v54 = vmul.f32 %v1429_v2, %v782_v60  ;;  %v855_v37 = vpop.f32.mrf.mxu1 }
 0x13a   : > { %v487_v25 = vsub.f32 2.0, %v471_v52  ;;  %v683_v43 = vmul.f32 %v667_v36, %v411_v33  ;;  %920 = vst [vmem:[%s1749_s6 + $0x10] sm:$0xff] %v904_v0  ;;  %v769_v23 = vadd.f32 1.0, %v1639_v34  ;;  %v767_v8 = vadd.f32 1.0, %v1643_v17 }
 0x13b   : > { %v630_v41 = vadd.f32 0.2548296, %v614_v24  ;;  %v537_v46 = vadd.f32 -1.4531521, %v521_v12  ;;  %v1755_v62 = vmul.f32 %v744_v48, %v1587_v19  ;;  %1203 = vrcp.f32 %v1746_v63  ;;  %918 = vst [vmem:[%s1749_s6] sm:$0xff] %v902_v54 }
 0x13c   : > { %v1188_v32 = vpop.eup %1187  ;;  %v1757_v10 = vmul.f32 %v1186_v55, %v487_v25  ;;  %v1760_v2 = vmul.f32 1.442695, %v683_v43  ;;  %v785_v17 = vmul.f32 %v769_v23, %v1449_v26  ;;  %v783_v55 = vmul.f32 %v767_v8, %v1451_v27 }
 0x13d   : > { %v1763_v33 = vpop.eup %1189  ;;  %v646_v49 = vmul.f32 %v630_v41, %v1685_v11  ;;  %v553_v60 = vmul.f32 %v537_v46, %v1739_v29  ;;  %v476_v34 = vmul.f32 %v1188_v32, %v1691_v45  ;;  %v843_v7 = vadd.f32 %v1416_v53, %v842_v57 }
 0x13e   : > { %v1769_v19 = vpop.eup %1191  ;;  %v519_v48 = vmul.f32 1.0614054, %v1757_v10  ;;  %v772_v52 = vadd.f32 1.0, %v1661_v38  ;;  %v905_v26 = vmul.f32 %v1629_v1, %v785_v17  ;;  %v864_v38 = vadd.f32 %v1091_v4, %v1416_v53 }
 0x13f   : > { %v1194_v30 = vpop.eup %1193  ;;  %v726_v11 = vmul.f32 %v1705_v44, %v646_v49  ;;  %v569_v36 = vadd.f32 1.4214138, %v553_v60  ;;  %v492_v45 = vsub.f32 2.0, %v476_v34  ;;  %v903_v0 = vmul.f32 %v843_v7, %v783_v55  ;;  %v1092_v44 = vpop.f32.mrf.mxu1 }
 0x140   : > { %v535_v24 = vadd.f32 -1.4531521, %v519_v48  ;;  %v474_v12 = vmul.f32 %v1194_v30, %v1707_v14  ;;  %v788_v25 = vmul.f32 %v772_v52, %v1465_v39  ;;  %921 = vst [vmem:[%s1749_s6 + $0x18] sm:$0xff] %v905_v26  ;;  %v770_v1 = vadd.f32 1.0, %v1699_v21 }
 0x141   : > { %v742_v43 = vsub.f32 1.0, %v726_v11  ;;  %v585_v27 = vmul.f32 %v569_v36, %v1739_v29  ;;  %v1780_v57 = vmul.f32 %v1188_v32, %v492_v45  ;;  %919 = vst [vmem:[%s1749_s6 + $0x8] sm:$0xff] %v903_v0  ;;  %v856_v14 = vadd.f32 %v1416_v53, %v855_v37  ;;  %v858_v7 = vpop.f32.mrf.mxu1 }
 0x142   : > { %v551_v54 = vmul.f32 %v535_v24, %v1757_v10  ;;  %v490_v41 = vsub.f32 2.0, %v474_v12  ;;  %v1788_v46 = vpop.eup %1195  ;;  %v908_v32 = vmul.f32 %v864_v38, %v788_v25  ;;  %v786_v34 = vmul.f32 %v770_v1, %v1473_v47 }
 0x143   : > { %v758_v39 = vmul.f32 %v742_v43, %v1618_v22  ;;  %v601_v23 = vadd.f32 -0.28449672, %v585_v27  ;;  %v524_v8 = vmul.f32 1.0614054, %v1780_v57  ;;  %v1198_v49 = vpop.eup %1197  ;;  %v773_v17 = vadd.f32 1.0, %v1702_v50 }
 0x144   : > { %v567_v4 = vadd.f32 1.4214138, %v551_v54  ;;  %v1792_v60 = vmul.f32 %v1194_v30, %v490_v41  ;;  %v1796_v21 = vpop.eup %1199  ;;  %v477_v22 = vmul.f32 %v1198_v49, %v1732_v61  ;;  %924 = vst [vmem:[%s1749_s6 + $0x30] sm:$0xff] %v908_v32  ;;  %v867_v55 = vadd.f32 %v1092_v44, %v1416_v53  ;;  %v1095_v54 = vpop.f32.mrf.mxu1 }
 0x145   : > { %v617_v37 = vmul.f32 %v601_v23, %v1739_v29  ;;  %v540_v48 = vadd.f32 -1.4531521, %v524_v8  ;;  %v1802_v52 = vpop.eup %1201  ;;  %v906_v11 = vmul.f32 %v856_v14, %v786_v34  ;;  %v789_v50 = vmul.f32 %v773_v17, %v1497_v13 }
 0x146   : > { %v583_v30 = vmul.f32 %v567_v4, %v1757_v10  ;;  %v522_v47 = vmul.f32 1.0614054, %v1792_v60  ;;  %v493_v26 = vsub.f32 2.0, %v477_v22  ;;  %v771_v61 = vadd.f32 1.0, %v1720_v15 }
 0x147   : > { %v633_v36 = vadd.f32 0.2548296, %v617_v37  ;;  %v556_v45 = vmul.f32 %v540_v48, %v1780_v57  ;;  %922 = vst [vmem:[%s1749_s6 + $0x20] sm:$0xff] %v906_v11  ;;  %v909_v0 = vmul.f32 %v867_v55, %v789_v50  ;;  %v859_v25 = vadd.f32 %v1416_v53, %v858_v7 }
 0x148   : > { %v599_v24 = vadd.f32 -0.28449672, %v583_v30  ;;  %v538_v12 = vadd.f32 -1.4531521, %v522_v47  ;;  %v1204_v43 = vpop.eup %1203  ;;  %v1812_v44 = vmul.f32 %v1198_v49, %v493_v26  ;;  %v787_v13 = vmul.f32 %v771_v61, %v1513_v31 }
 0x149   : > { %v649_v27 = vmul.f32 %v633_v36, %v1739_v29  ;;  %v572_v38 = vadd.f32 1.4214138, %v556_v45  ;;  %v475_v15 = vmul.f32 %v1204_v43, %v1746_v63  ;;  %925 = vst [vmem:[%s1749_s6 + $0x38] sm:$0xff] %v909_v0  ;;  %v776_v14 = vadd.f32 1.0, %v1755_v62 }
 0x14a   : > { %v615_v41 = vmul.f32 %v599_v24, %v1757_v10  ;;  %v554_v1 = vmul.f32 %v538_v12, %v1792_v60  ;;  %v525_v8 = vmul.f32 1.0614054, %v1812_v44  ;;  %v907_v32 = vmul.f32 %v859_v25, %v787_v13 }
 0x14b   : > { %v729_v23 = vmul.f32 %v1763_v33, %v649_v27  ;;  %v588_v29 = vmul.f32 %v572_v38, %v1780_v57  ;;  %vm380_vm13 = vcmp.ge.f32.partialorder %v1669_v59, 0.0  ;;  %v491_v4 = vsub.f32 2.0, %v475_v15  ;;  %v871_v33 = vpop.f32.mrf.mxu1 }
 0x14c   : > { %v631_v49 = vadd.f32 0.2548296, %v615_v41  ;;  %v570_v31 = vadd.f32 1.4214138, %v554_v1  ;;  %v792_v34 = vmul.f32 %v776_v14, %v1547_v35  ;;  %v541_v63 = vadd.f32 -1.4531521, %v525_v8 }
 0x14d   : > { %v745_v17 = vsub.f32 1.0, %v729_v23  ;;  %v604_v37 = vadd.f32 -0.28449672, %v588_v29  ;;  %923 = vst [vmem:[%s1749_s6 + $0x28] sm:$0xff] %v907_v32  ;;  %v880_v62 = vadd.f32 %v1095_v54, %v1416_v53  ;;  %v1829_v55 = vmul.f32 %v1204_v43, %v491_v4 }
 0x14e   : > { %v647_v48 = vmul.f32 %v631_v49, %v1757_v10  ;;  %v586_v22 = vmul.f32 %v570_v31, %v1792_v60  ;;  %v774_v7 = vadd.f32 1.0, %v758_v39  ;;  %v557_v35 = vmul.f32 %v541_v63, %v1812_v44 }
 0x14f   : > { %v761_v30 = vmul.f32 %v745_v17, %v1678_v58  ;;  %v620_v47 = vmul.f32 %v604_v37, %v1780_v57  ;;  %v912_v11 = vmul.f32 %v880_v62, %v792_v34  ;;  %v523_v45 = vmul.f32 1.0614054, %v1829_v55  ;;  %v1096_v58 = vpop.f32.mrf.mxu1 }
 0x150   : > { %v727_v50 = vmul.f32 %v1769_v19, %v647_v48  ;;  %v602_v36 = vadd.f32 -0.28449672, %v586_v22  ;;  %v790_v26 = vmul.f32 %v774_v7, %v1575_v18  ;;  %v573_v61 = vadd.f32 1.4214138, %v557_v35 }
 0x151   : > { %v636_v10 = vadd.f32 0.2548296, %v620_v47  ;;  %928 = vst [vmem:[%s1749_s6 + $0x50] sm:$0xff] %v912_v11  ;;  %v872_v24 = vadd.f32 %v1416_v53, %v871_v33  ;;  %v777_v39 = vadd.f32 1.0, %v761_v30  ;;  %v539_v25 = vadd.f32 -1.4531521, %v523_v45  ;;  %v874_v14 = vpop.f32.mrf.mxu1 }
 0x152   : > { %v743_v12 = vsub.f32 1.0, %v727_v50  ;;  %v618_v0 = vmul.f32 %v602_v36, %v1792_v60  ;;  %v883_v43 = vadd.f32 %v1096_v58, %v1416_v53  ;;  %v589_v27 = vmul.f32 %v573_v61, %v1812_v44 }
 0x153   : > { %v652_v19 = vmul.f32 %v636_v10, %v1780_v57  ;;  %v910_v38 = vmul.f32 %v872_v24, %v790_v26  ;;  %v793_v18 = vmul.f32 %v777_v39, %v1664_v20  ;;  %v555_v41 = vmul.f32 %v539_v25, %v1829_v55  ;;  %v1099_v37 = vpop.f32.mrf.mxu1 }
 0x154   : > { %v759_v13 = vmul.f32 %v743_v12, %v1716_v3  ;;  %v634_v54 = vadd.f32 0.2548296, %v618_v0  ;;  %1205 = vpow2.f32 %v1760_v2  ;;  %v605_v15 = vadd.f32 -0.28449672, %v589_v27 }
 0x155   : > { %v732_v1 = vmul.f32 %v1788_v46, %v652_v19  ;;  %926 = vst [vmem:[%s1749_s6 + $0x40] sm:$0xff] %v910_v38  ;;  %v913_v53 = vmul.f32 %v883_v43, %v793_v18  ;;  %v343_v57 = vmul.f32 0.5, %v1626_v40  ;;  %v571_v29 = vadd.f32 1.4214138, %v555_v41  ;;  %v1207_v40 = vld [vmem:[%s1933_s2] ss:$0 sm:$0xff] }
 0x156   : > { %v650_v23 = vmul.f32 %v634_v54, %v1792_v60  ;;  %v775_v20 = vadd.f32 1.0, %v759_v13  ;;  %v396_v3 = vsel %vm380_vm13, 1.0, %v1939_v51  ;;  %vm378_vm14 = vcmp.ge.f32.partialorder %v1675_v42, 0.0 }
 0x157   : > { %v748_v8 = vsub.f32 1.0, %v732_v1  ;;  %v621_v2 = vmul.f32 %v605_v15, %v1812_v44  ;;  %929 = vst [vmem:[%s1749_s6 + $0x58] sm:$0xff] %v913_v53  ;;  %v587_v32 = vmul.f32 %v571_v29, %v1829_v55  ;;  %v875_v60 = vadd.f32 %v1207_v40, %v874_v14 }
 0x158   : > { %v730_v46 = vmul.f32 %v1796_v21, %v650_v23  ;;  %v791_v49 = vmul.f32 %v775_v20, %v343_v57  ;;  %v348_v4 = vmul.f32 0.5, %v1653_v28  ;;  %v394_v63 = vsel %vm378_vm14, 1.0, %v1939_v51 }
 0x159   : > { %v764_v31 = vmul.f32 %v748_v8, %v396_v3  ;;  %v637_v59 = vadd.f32 0.2548296, %v621_v2  ;;  %v603_v42 = vadd.f32 -0.28449672, %v587_v32  ;;  %v896_v33 = vadd.f32 %v1207_v40, %v1099_v37 }
 0x15a   : > { %v746_v34 = vsub.f32 1.0, %v730_v46  ;;  %v911_v17 = vmul.f32 %v875_v60, %v791_v49  ;;  %vm381_vm15 = vcmp.ge.f32.partialorder %v1696_v16, 0.0  ;;  %v346_v30 = vmul.f32 0.5, %v1658_v9 }
 0x15b   : > { %v653_v21 = vmul.f32 %v637_v59, %v1812_v44  ;;  %v780_v62 = vadd.f32 1.0, %v764_v31  ;;  %v619_v22 = vmul.f32 %v603_v42, %v1829_v55  ;;  %v887_v44 = vpop.f32.mrf.mxu1  ;;  %v397_v36 = vsel %vm381_vm15, 1.0, %v1939_v51 }
 0x15c   : > { %v762_v48 = vmul.f32 %v746_v34, %v394_v63  ;;  %927 = vst [vmem:[%s1749_s6 + $0x48] sm:$0xff] %v911_v17  ;;  %v888_v10 = vadd.f32 %v1207_v40, %v887_v44  ;;  %vm379_vm0 = vcmp.ge.f32.partialorder %v1727_v6, 0.0  ;;  %v347_v27 = vmul.f32 0.5, %v1710_v56 }
 0x15d   : > { %v733_v7 = vmul.f32 %v1802_v52, %v653_v21  ;;  %v796_v28 = vmul.f32 %v780_v62, %v348_v4  ;;  %v635_v47 = vadd.f32 0.2548296, %v619_v22  ;;  %v349_v52 = vmul.f32 0.5, %v1683_v5  ;;  %v1100_v58 = vpop.f32.mrf.mxu1 }
 0x15e   : > { %v778_v35 = vadd.f32 1.0, %v762_v48  ;;  %v899_v25 = vadd.f32 %v1207_v40, %v1100_v58 }
 0x15f   : > { %v749_v11 = vsub.f32 1.0, %v733_v7  ;;  %v916_v50 = vmul.f32 %v896_v33, %v796_v28  ;;  %v651_v45 = vmul.f32 %v635_v47, %v1829_v55  ;;  %v395_v55 = vsel %vm379_vm0, 1.0, %v1939_v51  ;;  %v890_v6 = vpop.f32.mrf.mxu1 }
 0x160   : > { %v794_v26 = vmul.f32 %v778_v35, %v346_v30  ;;  %v891_v18 = vadd.f32 %v1207_v40, %v890_v6 }
 0x161   : > { %v1206_v61 = vpop.eup %1205  ;;  %v765_v24 = vmul.f32 %v749_v11, %v397_v36  ;;  %932 = vst [vmem:[%s1749_s6 + $0x70] sm:$0xff] %v916_v50 }
 0x162   : > { %v731_v16 = vmul.f32 %v1206_v61, %v651_v45  ;;  %v914_v9 = vmul.f32 %v888_v10, %v794_v26 }
 0x163   : > { %v781_v39 = vadd.f32 1.0, %v765_v24 }
 0x164   : > { %v747_v12 = vsub.f32 1.0, %v731_v16  ;;  %930 = vst [vmem:[%s1749_s6 + $0x60] sm:$0xff] %v914_v9 }
 0x165   : > { %v797_v0 = vmul.f32 %v781_v39, %v349_v52 }
 0x166   : > { %v763_v43 = vmul.f32 %v747_v12, %v395_v55 }
 0x167   : > { %v917_v19 = vmul.f32 %v899_v25, %v797_v0 }
 0x168   : > { %v779_v38 = vadd.f32 1.0, %v763_v43 }
 0x169   : > { %933 = vst [vmem:[%s1749_s6 + $0x78] sm:$0xff] %v917_v19 }
 0x16a   : > { %v795_v5 = vmul.f32 %v779_v38, %v347_v27 }
 0x16c   : > { %v915_v51 = vmul.f32 %v891_v18, %v795_v5 }
 0x16e   : > { %931 = vst [vmem:[%s1749_s6 + $0x68] sm:$0xff] %v915_v51 }
 0x16f   : > { %1221 = shalt.err (!%p1218_p3)
}
 0x170   : > { %s1222_s27 = scalar_lea.hbm %s1884_s19, 2048  ;;  %s1226_s30 = scalar_lea.hbm %s1934_s3, 4096 }
 0x171   : > { %p1223_p4 = scmp.ne.s32.totalorder %s1884_s19, %s1222_s27  ;;  %p1227_p9 = scmp.lt.s32.totalorder %s1884_s19, %s1934_s3 }
 0x172   : > { %p1228_p10 = scmp.lt.s32.totalorder %s1226_s30, %s1222_s27 }
 0x173   : > { %p1224_p7 = pnand %p1223_p4, %p1332_p5 }
 0x174   : > { %p1229_p11 = por %p1228_p10, %p1227_p9 }
 0x175   : > { %p1225_p8 = pneg %p1224_p7 }
 0x177   : > { %p1230_p12 = pnand %p1229_p11, %p1225_p8 }
 0x179   : > { %1233 = shalt.err (!%p1230_p12)
}
 0x17a   : > { %s1272_s6 = smov 128   ;;  %s1273_s7 = smov 8  }
 0x17b   : > { %1101 = dma.vmem_to_hbm [thread:$0]  (%p1332_p5), %s1886_s10, 2048, %s1884_s19, %s1891_s20, %s1272_s6, %s1272_s6, %s1273_s7  }
 0x17c PF: > { %p1107_p13 = scmp.ge.s32.totalorder %s1268_s15, 2  ;;  %s963_s8 = sand.u32 1, %s1256_s12  }
 0x17d   : > { %s964_s9 = scalar_lea.sflag [#allocation3], %s963_s8 }
 0x17e   : > { %p1104_p0 = pnand %p1107_p13, %p1336_p6 }
 0x180   : > { %p1105_p1 = pneg %p1104_p0 }
 0x182   : > { %1251 = dma.done.wait (%p1105_p1), %s964_s9, 2048  }
 0x183   : > { %1253 = vsyncadd (%p1105_p1), %s964_s9, 4294965248  ;;  %p13_p2 = scmp.ge.s32.totalorder %s1319_s18, 4   ;;  %s1940_s12 = smov %s1260_s13 }
 0x184   : > { %s1941_s13 = smov %s1264_s14  ;;  %s1942_s14 = smov %s1330_s21 }
 0x185   : > { %s1943_s15 = smov %s1319_s18  ;;  %15 = sbr.rel (!%p13_p2) target bundleno = 3 (0x3), region = 67 }
 0x18a   :  { %969 = vsyncpa [#allocation3], 1 }
 0x18b   :  { %971 = vsyncpa [#allocation3 + $0x1], 1 }

</bundles_post_ra>
